<compile_context>
chip_gen: v7x
topology: tpu7x:2x2x1
jax: 0.10.0
libtpu: 0.0.40
codegen_flags: <defaults>
</compile_context>

<pallas_src>
import jax
import jax.numpy as jnp
from jax.experimental import pallas as pl
from jax.experimental.pallas import tpu as pltpu


# --------------------------------------------------------------------------- #
# Shape helpers
# --------------------------------------------------------------------------- #
def _stage_lengths(length):
    """Per conv stage: (conv_len, pooled_len) for k=3 valid conv + MaxPool1d(2,2)."""
    lens = []
    cur = length
    for _ in range(4):
        conv = cur - 2
        pool = conv // 2
        lens.append((conv, pool))
        cur = pool
    return lens


def _round_up(n, m):
    return ((n + m - 1) // m) * m


def _block_diag(w, g):
    """(k, n) -> (g*k, g*n) with `w` repeated on the diagonal blocks."""
    k, n = w.shape
    eye = jnp.eye(g, dtype=w.dtype)
    return (eye[:, None, :, None] * w[None, :, None, :]).reshape(g * k, g * n)


def _fused_conv_rhs(w, g):
    """Fused even/odd conv+pool RHS for G lane-packed samples.

    w: (Cout, Cin, 3) PyTorch Conv1d weight.  Returns (4*Cin*G, 2*Cout*G):
      row index    = tap j (0..3) * Cin*G + sample g * Cin + c
      column index = phase h (0=even, 1=odd) * Cout*G + sample g * Cout + o
    Even phase (conv position 2l) uses taps 0..2, odd phase (2l+1) taps 1..3;
    the block-diagonal structure keeps the G samples independent.
    """
    taps = [_block_diag(w[:, :, k].T, g) for k in range(3)]       # (Cin*G, Cout*G)
    zero = jnp.zeros_like(taps[0])
    even = jnp.concatenate([taps[0], taps[1], taps[2], zero], axis=0)
    odd = jnp.concatenate([zero, taps[0], taps[1], taps[2]], axis=0)
    return jnp.concatenate([even, odd], axis=1)                   # (4CinG, 2CoutG)


def _conv_vmem_bytes(l1p, l2p, l3p, l4p, g):
    """Per-step VMEM footprint estimate: scratch + double-buffered I/O + dot temps."""
    fb = 4  # f32 bytes
    lane = lambda c: _round_up(c, 128)
    c1, c2, c3, c4 = 32 * g, 16 * g, 8 * g, 4 * g
    scratch = l1p * lane(c1) + l2p * lane(c2) + l3p * lane(c3)
    io = 2 * (l1p * lane(4 * g) + l4p * lane(c4))                 # double-buffered
    temps = (l1p * lane(2 * c1)
             + l2p * (lane(4 * c1) + lane(2 * c2))
             + l3p * (lane(4 * c2) + lane(2 * c3))
             + l4p * (lane(4 * c3) + lane(2 * c4)))
    total = fb * (scratch + io + temps) + (6 << 20)               # weights + slack
    return int(max(16 << 20, min(96 << 20, _round_up(total, 1 << 20))))


# --------------------------------------------------------------------------- #
# Kernels
# --------------------------------------------------------------------------- #
def _fused_stage(src_ref, rhs_ref, bias_ref, out_shape):
    """Conv1d(k=3, valid) + bias + ReLU + MaxPool1d(2,2) for G lane-packed samples.

    src_ref: (Lin, Cin*G) pooled activations of the previous stage (VMEM).
    rhs_ref: (4*Cin*G, 2*Cout*G) fused even/odd block-diagonal weight.
    bias_ref:(1, Cout*G).  Returns the pooled (Lp, Cout*G) activation.
    """
    lp, c_out = out_shape
    # Tap-packed LHS: lanes = [y[2l], y[2l+1], y[2l+2], y[2l+3]].
    lhs = jnp.concatenate(
        [src_ref[pl.ds(j, lp, stride=2), :] for j in range(4)], axis=1)
    d = jnp.dot(lhs, rhs_ref[...], preferred_element_type=jnp.float32)
    # max(relu(even+b), relu(odd+b)) == relu(max(even, odd) + b)  (exact).
    return jnp.maximum(jnp.maximum(d[:, :c_out], d[:, c_out:]) + bias_ref[...], 0.0)


def _conv_stack_kernel(x_ref, r1, b1, r2, b2, r3, b3, r4, b4,
                       o_ref, p1_ref, p2_ref, p3_ref):
    # ---- stage 1: input is already tap-packed (l1p, 4*G) -> one MXU dot ----
    c1 = p1_ref.shape[1]
    d1 = jnp.dot(x_ref[...], r1[...], preferred_element_type=jnp.float32)
    p1_ref[...] = jnp.maximum(jnp.maximum(d1[:, :c1], d1[:, c1:]) + b1[...], 0.0)
    # ---- stages 2-4: fused conv+pool, one dot per stage ---------------------
    p2_ref[...] = _fused_stage(p1_ref, r2, b2, p2_ref.shape)
    p3_ref[...] = _fused_stage(p2_ref, r3, b3, p3_ref.shape)
    o_ref[...] = _fused_stage(p3_ref, r4, b4, o_ref.shape)


def _fc_head_kernel(p4_ref, w1, b1, w2, b2, w3, b3, o_ref):
    h = jnp.maximum(
        jnp.dot(p4_ref[...], w1[...], preferred_element_type=jnp.float32) + b1[...],
        0.0)
    h = jnp.maximum(
        jnp.dot(h, w2[...], preferred_element_type=jnp.float32) + b2[...], 0.0)
    o_ref[...] = jnp.dot(h, w3[...], preferred_element_type=jnp.float32) + b3[...]


def _const_spec(shape):
    if len(shape) != 2:
        raise ValueError(shape)
    return pl.BlockSpec(shape, lambda b: (0, 0))


# --------------------------------------------------------------------------- #
# Wrapper
# --------------------------------------------------------------------------- #
def nmr1dcnn_forward(x_ncl, params, *, group_size=4):
    """x_ncl: (B, 1, L) float32 (PyTorch NCL layout). Returns (B, 1) float32."""
    B, _, L = x_ncl.shape
    G = group_size
    (_, l1p), (_, l2p), (_, l3p), (_, l4p) = _stage_lengths(L)

    # ---- batch padding + tap/lane packing (wrapper-side layout plumbing) ----
    Bp = _round_up(B, G)
    x_flat = x_ncl.reshape(B, L).astype(jnp.float32)
    if Bp != B:
        x_flat = jnp.concatenate(
            [x_flat, jnp.zeros((Bp - B, L), jnp.float32)], axis=0)
    # x_packed[b, l, j*G + g] = x[b*G + g, 2l + j]  -> stage-1 MXU LHS.
    idx = 2 * jnp.arange(l1p)[:, None] + jnp.arange(4)[None, :]   # (l1p, 4)
    xg = x_flat.reshape(Bp // G, G, L)
    x_packed = xg[:, :, idx].transpose(0, 2, 3, 1).reshape(Bp // G, l1p, 4 * G)

    # ---- conv weights: fused even/odd, block-diagonal over the G samples ----
    r1 = _fused_conv_rhs(params["conv1_w"], G)                    # (4G,   64G)
    r2 = _fused_conv_rhs(params["conv2_w"], G)                    # (128G, 32G)
    r3 = _fused_conv_rhs(params["conv3_w"], G)                    # (64G,  16G)
    r4 = _fused_conv_rhs(params["conv4_w"], G)                    # (32G,   8G)
    b1 = jnp.tile(params["conv1_b"], G).reshape(1, 32 * G)
    b2 = jnp.tile(params["conv2_b"], G).reshape(1, 16 * G)
    b3 = jnp.tile(params["conv3_b"], G).reshape(1, 8 * G)
    b4 = jnp.tile(params["conv4_b"], G).reshape(1, 4 * G)
    conv_consts = tuple(c.astype(jnp.float32)
                        for c in (r1, b1, r2, b2, r3, b3, r4, b4))

    p4 = pl.pallas_call(
        _conv_stack_kernel,
        out_shape=jax.ShapeDtypeStruct((Bp // G, l4p, 4 * G), jnp.float32),
        grid=(Bp // G,),
        in_specs=[pl.BlockSpec((None, l1p, 4 * G), lambda b: (b, 0, 0))]
                 + [_const_spec(c.shape) for c in conv_consts],
        out_specs=pl.BlockSpec((None, l4p, 4 * G), lambda b: (b, 0, 0)),
        scratch_shapes=[pltpu.VMEM((l1p, 32 * G), jnp.float32),
                        pltpu.VMEM((l2p, 16 * G), jnp.float32),
                        pltpu.VMEM((l3p, 8 * G), jnp.float32)],
        compiler_params=pltpu.CompilerParams(
            dimension_semantics=("parallel",),
            vmem_limit_bytes=_conv_vmem_bytes(l1p, l2p, l3p, l4p, G)),
    )(x_packed, *conv_consts)

    # ---- de-interleave the lane-packed groups (tiny array, plain JAX) -------
    p4_flat = (p4.reshape(Bp // G, l4p, G, 4)
                 .transpose(0, 2, 1, 3)
                 .reshape(Bp, 4 * l4p))            # row = b*G+g, col = l*4 + c

    # ---- FC head as batched (M = B) matmuls ---------------------------------
    # PyTorch's .view flatten is channel-major (c*L4 + l); permute fc1's weight
    # to the kernel's position-major (l*4 + c) order instead of transposing p4.
    wf1 = (params["fc1_w"].reshape(128, 4, l4p)
           .transpose(2, 1, 0).reshape(4 * l4p, 128))
    fc_consts = tuple(c.astype(jnp.float32) for c in (
        wf1, params["fc1_b"].reshape(1, 128),
        params["fc2_w"].T, params["fc2_b"].reshape(1, 64),
        params["fc3_w"].T, params["fc3_b"].reshape(1, 1)))

    out = pl.pallas_call(
        _fc_head_kernel,
        out_shape=jax.ShapeDtypeStruct((Bp, 1), jnp.float32),
        grid=(1,),
        in_specs=[_const_spec(p4_flat.shape)]
                 + [_const_spec(c.shape) for c in fc_consts],
        out_specs=pl.BlockSpec((Bp, 1), lambda i: (0, 0)),
        compiler_params=pltpu.CompilerParams(
            dimension_semantics=("arbitrary",)),
    )(p4_flat, *fc_consts)
    return out[:B]


# --------------------------------------------------------------------------- #
# Pure-JAX reference (PyTorch semantics) + self-test
# --------------------------------------------------------------------------- #
def _reference_forward(x_ncl, params):
    def stage(x, w, b):
        lout = x.shape[2] - 2
        acc = b[None, :, None]
        for k in range(3):
            acc = acc + jnp.einsum("bcl,oc->bol", x[:, :, k:k + lout], w[:, :, k],
                                   precision=jax.lax.Precision.HIGHEST)
        a = jnp.maximum(acc, 0.0)
        lp = lout // 2
        return jnp.maximum(a[:, :, 0:2 * lp:2], a[:, :, 1:2 * lp:2])

    x = x_ncl
    x = stage(x, params["conv1_w"], params["conv1_b"])
    x = stage(x, params["conv2_w"], params["conv2_b"])
    x = stage(x, params["conv3_w"], params["conv3_b"])
    x = stage(x, params["conv4_w"], params["conv4_b"])
    flat = x.reshape(x.shape[0], -1)                 # channel-major, like .view
    h = jnp.maximum(flat @ params["fc1_w"].T + params["fc1_b"], 0.0)
    h = jnp.maximum(h @ params["fc2_w"].T + params["fc2_b"], 0.0)
    return h @ params["fc3_w"].T + params["fc3_b"]


if __name__ == "__main__":
    key = jax.random.PRNGKey(0)
    B, L = 8, 128                       # small shapes (module default L=6554)
    (_, _), (_, _), (_, _), (_, l4p) = _stage_lengths(L)
    flattened = 4 * l4p                 # = 24 for L=128

    keys = jax.random.split(key, 15)

    def init(k, shape, scale=0.1):
        return scale * jax.random.normal(k, shape, dtype=jnp.float32)

    params = {
        "conv1_w": init(keys[0], (32, 1, 3)),  "conv1_b": init(keys[1], (32,)),
        "conv2_w": init(keys[2], (16, 32, 3)), "conv2_b": init(keys[3], (16,)),
        "conv3_w": init(keys[4], (8, 16, 3)),  "conv3_b": init(keys[5], (8,)),
        "conv4_w": init(keys[6], (4, 8, 3)),   "conv4_b": init(keys[7], (4,)),
        "fc1_w": init(keys[8], (128, flattened)), "fc1_b": init(keys[9], (128,)),
        "fc2_w": init(keys[10], (64, 128)),    "fc2_b": init(keys[11], (64,)),
        "fc3_w": init(keys[12], (1, 64)),      "fc3_b": init(keys[13], (1,)),
    }
    x = jax.random.normal(keys[14], (B, 1, L), dtype=jnp.float32)

    out = jax.block_until_ready(nmr1dcnn_forward(x, params))

    ref = _reference_forward(x, params)
    if out.shape != ref.shape:
        raise AssertionError(f"shape mismatch: {out.shape} vs {ref.shape}")
    if not jnp.allclose(out, ref, atol=1e-5, rtol=1e-5):
        err = jnp.max(jnp.abs(out - ref))
        raise AssertionError(
            f"kernel/reference mismatch (max abs err {err}):\n{out}\nvs\n{ref}")
    print("KERNEL_OK")
</pallas_src>

<mosaic_0001>
module attributes {stable_mosaic.version = 11 : i64} {
  func.func @_conv_stack_kernel(%arg0: i32, %arg1: memref<1x63x16xf32, #tpu.memory_space<vmem>>, %arg2: memref<16x256xf32, #tpu.memory_space<vmem>>, %arg3: memref<1x128xf32, #tpu.memory_space<vmem>>, %arg4: memref<512x128xf32, #tpu.memory_space<vmem>>, %arg5: memref<1x64xf32, #tpu.memory_space<vmem>>, %arg6: memref<256x64xf32, #tpu.memory_space<vmem>>, %arg7: memref<1x32xf32, #tpu.memory_space<vmem>>, %arg8: memref<128x32xf32, #tpu.memory_space<vmem>>, %arg9: memref<1x16xf32, #tpu.memory_space<vmem>>, %arg10: memref<1x6x16xf32, #tpu.memory_space<vmem>>, %arg11: memref<63x128xf32, #tpu.memory_space<vmem>>, %arg12: memref<30x64xf32, #tpu.memory_space<vmem>>, %arg13: memref<14x32xf32, #tpu.memory_space<vmem>>) attributes {dimension_semantics = [#tpu.dimension_semantics<parallel>], iteration_bounds = array<i64: 2>, scalar_prefetch = 0 : i64, scratch_operands = 3 : i64, tpu.core_type = #tpu.core_type<tc>, window_params = [{transform_indices = @transform_0, window_bounds = array<i64: 1, 63, 16>}, {pipeline_mode = #tpu.pipeline_mode<synchronous>, transform_indices = @transform_1, window_bounds = array<i64: 16, 256>}, {pipeline_mode = #tpu.pipeline_mode<synchronous>, transform_indices = @transform_2, window_bounds = array<i64: 1, 128>}, {pipeline_mode = #tpu.pipeline_mode<synchronous>, transform_indices = @transform_3, window_bounds = array<i64: 512, 128>}, {pipeline_mode = #tpu.pipeline_mode<synchronous>, transform_indices = @transform_4, window_bounds = array<i64: 1, 64>}, {pipeline_mode = #tpu.pipeline_mode<synchronous>, transform_indices = @transform_5, window_bounds = array<i64: 256, 64>}, {pipeline_mode = #tpu.pipeline_mode<synchronous>, transform_indices = @transform_6, window_bounds = array<i64: 1, 32>}, {pipeline_mode = #tpu.pipeline_mode<synchronous>, transform_indices = @transform_7, window_bounds = array<i64: 128, 32>}, {pipeline_mode = #tpu.pipeline_mode<synchronous>, transform_indices = @transform_8, window_bounds = array<i64: 1, 16>}, {transform_indices = @transform_9, window_bounds = array<i64: 1, 6, 16>}]} {
    %c0 = arith.constant 0 : index
    %c0_0 = arith.constant 0 : index
    %c0_1 = arith.constant 0 : index
    %0 = vector.load %arg1[%c0, %c0_0, %c0_1] : memref<1x63x16xf32, #tpu.memory_space<vmem>>, vector<1x63x16xf32>
    %1 = vector.shape_cast %0 : vector<1x63x16xf32> to vector<63x16xf32>
    %c0_2 = arith.constant 0 : index
    %c0_3 = arith.constant 0 : index
    %2 = vector.load %arg2[%c0_2, %c0_3] : memref<16x256xf32, #tpu.memory_space<vmem>>, vector<16x256xf32>
    %cst = arith.constant dense<0.000000e+00> : vector<63x256xf32>
    %3 = tpu.matmul %1, %2, %cst {dimension_numbers = #tpu.dot_dimension_numbers<[1], [0], [0], [1], [0, 0, 1, 1], [], []>} : vector<63x16xf32>, vector<16x256xf32>, vector<63x256xf32> -> vector<63x256xf32>
    %4 = vector.extract_strided_slice %3 {offsets = [0, 0], sizes = [63, 128], strides = [1, 1]} : vector<63x256xf32> to vector<63x128xf32>
    %5 = vector.extract_strided_slice %3 {offsets = [0, 128], sizes = [63, 128], strides = [1, 1]} : vector<63x256xf32> to vector<63x128xf32>
    %6 = arith.maximumf %4, %5 : vector<63x128xf32>
    %c0_4 = arith.constant 0 : index
    %c0_5 = arith.constant 0 : index
    %7 = vector.load %arg3[%c0_4, %c0_5] : memref<1x128xf32, #tpu.memory_space<vmem>>, vector<1x128xf32>
    %8 = vector.broadcast %7 : vector<1x128xf32> to vector<63x128xf32>
    %9 = arith.addf %6, %8 : vector<63x128xf32>
    %cst_6 = arith.constant 0.000000e+00 : f32
    %10 = vector.broadcast %cst_6 : f32 to vector<63x128xf32>
    %11 = arith.maximumf %9, %10 : vector<63x128xf32>
    %c0_7 = arith.constant 0 : index
    %c0_8 = arith.constant 0 : index
    %12 = vector.load %arg11[%c0_7, %c0_8] : memref<63x128xf32, #tpu.memory_space<vmem>>, vector<63x128xf32>
    tpu.vector_store %arg11[%c0_7, %c0_8], %11 {strides = array<i32>} : memref<63x128xf32, #tpu.memory_space<vmem>>, vector<63x128xf32>,
    %c0_9 = arith.constant 0 : index
    %c0_10 = arith.constant 0 : index
    %13 = tpu.strided_load %arg11[%c0_9, %c0_10] {strides = array<i32: 2, 1>} : memref<63x128xf32, #tpu.memory_space<vmem>>, vector<30x128xf32>
    %c1 = arith.constant 1 : index
    %c0_11 = arith.constant 0 : index
    %14 = tpu.strided_load %arg11[%c1, %c0_11] {strides = array<i32: 2, 1>} : memref<63x128xf32, #tpu.memory_space<vmem>>, vector<30x128xf32>
    %c2 = arith.constant 2 : index
    %c0_12 = arith.constant 0 : index
    %15 = tpu.strided_load %arg11[%c2, %c0_12] {strides = array<i32: 2, 1>} : memref<63x128xf32, #tpu.memory_space<vmem>>, vector<30x128xf32>
    %c3 = arith.constant 3 : index
    %c0_13 = arith.constant 0 : index
    %16 = tpu.strided_load %arg11[%c3, %c0_13] {strides = array<i32: 2, 1>} : memref<63x128xf32, #tpu.memory_space<vmem>>, vector<30x128xf32>
    %17 = tpu.concatenate %13, %14, %15, %16 in 1 : vector<30x128xf32>, vector<30x128xf32>, vector<30x128xf32>, vector<30x128xf32> -> vector<30x512xf32>
    %c0_14 = arith.constant 0 : index
    %c0_15 = arith.constant 0 : index
    %18 = vector.load %arg4[%c0_14, %c0_15] : memref<512x128xf32, #tpu.memory_space<vmem>>, vector<512x128xf32>
    %cst_16 = arith.constant dense<0.000000e+00> : vector<30x128xf32>
    %19 = tpu.matmul %17, %18, %cst_16 {dimension_numbers = #tpu.dot_dimension_numbers<[1], [0], [0], [1], [0, 0, 1, 1], [], []>} : vector<30x512xf32>, vector<512x128xf32>, vector<30x128xf32> -> vector<30x128xf32>
    %20 = vector.extract_strided_slice %19 {offsets = [0, 0], sizes = [30, 64], strides = [1, 1]} : vector<30x128xf32> to vector<30x64xf32>
    %21 = vector.extract_strided_slice %19 {offsets = [0, 64], sizes = [30, 64], strides = [1, 1]} : vector<30x128xf32> to vector<30x64xf32>
    %22 = arith.maximumf %20, %21 : vector<30x64xf32>
    %c0_17 = arith.constant 0 : index
    %c0_18 = arith.constant 0 : index
    %23 = vector.load %arg5[%c0_17, %c0_18] : memref<1x64xf32, #tpu.memory_space<vmem>>, vector<1x64xf32>
    %24 = vector.broadcast %23 : vector<1x64xf32> to vector<30x64xf32>
    %25 = arith.addf %22, %24 : vector<30x64xf32>
    %cst_19 = arith.constant 0.000000e+00 : f32
    %26 = vector.broadcast %cst_19 : f32 to vector<30x64xf32>
    %27 = arith.maximumf %25, %26 : vector<30x64xf32>
    %c0_20 = arith.constant 0 : index
    %c0_21 = arith.constant 0 : index
    %28 = vector.load %arg12[%c0_20, %c0_21] : memref<30x64xf32, #tpu.memory_space<vmem>>, vector<30x64xf32>
    tpu.vector_store %arg12[%c0_20, %c0_21], %27 {strides = array<i32>} : memref<30x64xf32, #tpu.memory_space<vmem>>, vector<30x64xf32>,
    %c0_22 = arith.constant 0 : index
    %c0_23 = arith.constant 0 : index
    %29 = tpu.strided_load %arg12[%c0_22, %c0_23] {strides = array<i32: 2, 1>} : memref<30x64xf32, #tpu.memory_space<vmem>>, vector<14x64xf32>
    %c1_24 = arith.constant 1 : index
    %c0_25 = arith.constant 0 : index
    %30 = tpu.strided_load %arg12[%c1_24, %c0_25] {strides = array<i32: 2, 1>} : memref<30x64xf32, #tpu.memory_space<vmem>>, vector<14x64xf32>
    %c2_26 = arith.constant 2 : index
    %c0_27 = arith.constant 0 : index
    %31 = tpu.strided_load %arg12[%c2_26, %c0_27] {strides = array<i32: 2, 1>} : memref<30x64xf32, #tpu.memory_space<vmem>>, vector<14x64xf32>
    %c3_28 = arith.constant 3 : index
    %c0_29 = arith.constant 0 : index
    %32 = tpu.strided_load %arg12[%c3_28, %c0_29] {strides = array<i32: 2, 1>} : memref<30x64xf32, #tpu.memory_space<vmem>>, vector<14x64xf32>
    %33 = tpu.concatenate %29, %30, %31, %32 in 1 : vector<14x64xf32>, vector<14x64xf32>, vector<14x64xf32>, vector<14x64xf32> -> vector<14x256xf32>
    %c0_30 = arith.constant 0 : index
    %c0_31 = arith.constant 0 : index
    %34 = vector.load %arg6[%c0_30, %c0_31] : memref<256x64xf32, #tpu.memory_space<vmem>>, vector<256x64xf32>
    %cst_32 = arith.constant dense<0.000000e+00> : vector<14x64xf32>
    %35 = tpu.matmul %33, %34, %cst_32 {dimension_numbers = #tpu.dot_dimension_numbers<[1], [0], [0], [1], [0, 0, 1, 1], [], []>} : vector<14x256xf32>, vector<256x64xf32>, vector<14x64xf32> -> vector<14x64xf32>
    %36 = vector.extract_strided_slice %35 {offsets = [0, 0], sizes = [14, 32], strides = [1, 1]} : vector<14x64xf32> to vector<14x32xf32>
    %37 = vector.extract_strided_slice %35 {offsets = [0, 32], sizes = [14, 32], strides = [1, 1]} : vector<14x64xf32> to vector<14x32xf32>
    %38 = arith.maximumf %36, %37 : vector<14x32xf32>
    %c0_33 = arith.constant 0 : index
    %c0_34 = arith.constant 0 : index
    %39 = vector.load %arg7[%c0_33, %c0_34] : memref<1x32xf32, #tpu.memory_space<vmem>>, vector<1x32xf32>
    %40 = vector.broadcast %39 : vector<1x32xf32> to vector<14x32xf32>
    %41 = arith.addf %38, %40 : vector<14x32xf32>
    %cst_35 = arith.constant 0.000000e+00 : f32
    %42 = vector.broadcast %cst_35 : f32 to vector<14x32xf32>
    %43 = arith.maximumf %41, %42 : vector<14x32xf32>
    %c0_36 = arith.constant 0 : index
    %c0_37 = arith.constant 0 : index
    %44 = vector.load %arg13[%c0_36, %c0_37] : memref<14x32xf32, #tpu.memory_space<vmem>>, vector<14x32xf32>
    tpu.vector_store %arg13[%c0_36, %c0_37], %43 {strides = array<i32>} : memref<14x32xf32, #tpu.memory_space<vmem>>, vector<14x32xf32>,
    %c0_38 = arith.constant 0 : index
    %c0_39 = arith.constant 0 : index
    %45 = tpu.strided_load %arg13[%c0_38, %c0_39] {strides = array<i32: 2, 1>} : memref<14x32xf32, #tpu.memory_space<vmem>>, vector<6x32xf32>
    %c1_40 = arith.constant 1 : index
    %c0_41 = arith.constant 0 : index
    %46 = tpu.strided_load %arg13[%c1_40, %c0_41] {strides = array<i32: 2, 1>} : memref<14x32xf32, #tpu.memory_space<vmem>>, vector<6x32xf32>
    %c2_42 = arith.constant 2 : index
    %c0_43 = arith.constant 0 : index
    %47 = tpu.strided_load %arg13[%c2_42, %c0_43] {strides = array<i32: 2, 1>} : memref<14x32xf32, #tpu.memory_space<vmem>>, vector<6x32xf32>
    %c3_44 = arith.constant 3 : index
    %c0_45 = arith.constant 0 : index
    %48 = tpu.strided_load %arg13[%c3_44, %c0_45] {strides = array<i32: 2, 1>} : memref<14x32xf32, #tpu.memory_space<vmem>>, vector<6x32xf32>
    %49 = tpu.concatenate %45, %46, %47, %48 in 1 : vector<6x32xf32>, vector<6x32xf32>, vector<6x32xf32>, vector<6x32xf32> -> vector<6x128xf32>
    %c0_46 = arith.constant 0 : index
    %c0_47 = arith.constant 0 : index
    %50 = vector.load %arg8[%c0_46, %c0_47] : memref<128x32xf32, #tpu.memory_space<vmem>>, vector<128x32xf32>
    %cst_48 = arith.constant dense<0.000000e+00> : vector<6x32xf32>
    %51 = tpu.matmul %49, %50, %cst_48 {dimension_numbers = #tpu.dot_dimension_numbers<[1], [0], [0], [1], [0, 0, 1, 1], [], []>} : vector<6x128xf32>, vector<128x32xf32>, vector<6x32xf32> -> vector<6x32xf32>
    %52 = vector.extract_strided_slice %51 {offsets = [0, 0], sizes = [6, 16], strides = [1, 1]} : vector<6x32xf32> to vector<6x16xf32>
    %53 = vector.extract_strided_slice %51 {offsets = [0, 16], sizes = [6, 16], strides = [1, 1]} : vector<6x32xf32> to vector<6x16xf32>
    %54 = arith.maximumf %52, %53 : vector<6x16xf32>
    %c0_49 = arith.constant 0 : index
    %c0_50 = arith.constant 0 : index
    %55 = vector.load %arg9[%c0_49, %c0_50] : memref<1x16xf32, #tpu.memory_space<vmem>>, vector<1x16xf32>
    %56 = vector.broadcast %55 : vector<1x16xf32> to vector<6x16xf32>
    %57 = arith.addf %54, %56 : vector<6x16xf32>
    %cst_51 = arith.constant 0.000000e+00 : f32
    %58 = vector.broadcast %cst_51 : f32 to vector<6x16xf32>
    %59 = arith.maximumf %57, %58 : vector<6x16xf32>
    %c0_52 = arith.constant 0 : index
    %c0_53 = arith.constant 0 : index
    %c0_54 = arith.constant 0 : index
    %60 = vector.load %arg10[%c0_52, %c0_53, %c0_54] : memref<1x6x16xf32, #tpu.memory_space<vmem>>, vector<1x6x16xf32>
    %61 = vector.shape_cast %60 : vector<1x6x16xf32> to vector<6x16xf32>
    %62 = vector.shape_cast %59 : vector<6x16xf32> to vector<1x6x16xf32>
    tpu.vector_store %arg10[%c0_52, %c0_53, %c0_54], %62 {strides = array<i32>} : memref<1x6x16xf32, #tpu.memory_space<vmem>>, vector<1x6x16xf32>,
    return
  }
  func.func @transform_0(%arg0: i32) -> (i32, i32, i32) {
    %c0_i32 = arith.constant 0 : i32
    %c0_i32_0 = arith.constant 0 : i32
    %c0_i32_1 = arith.constant 0 : i32
    return %arg0, %c0_i32, %c0_i32_0 : i32, i32, i32
  }
  func.func @transform_1(%arg0: i32) -> (i32, i32) {
    %c0_i32 = arith.constant 0 : i32
    %c0_i32_0 = arith.constant 0 : i32
    %c0_i32_1 = arith.constant 0 : i32
    return %c0_i32, %c0_i32_0 : i32, i32
  }
  func.func @transform_2(%arg0: i32) -> (i32, i32) {
    %c0_i32 = arith.constant 0 : i32
    %c0_i32_0 = arith.constant 0 : i32
    %c0_i32_1 = arith.constant 0 : i32
    return %c0_i32, %c0_i32_0 : i32, i32
  }
  func.func @transform_3(%arg0: i32) -> (i32, i32) {
    %c0_i32 = arith.constant 0 : i32
    %c0_i32_0 = arith.constant 0 : i32
    %c0_i32_1 = arith.constant 0 : i32
    return %c0_i32, %c0_i32_0 : i32, i32
  }
  func.func @transform_4(%arg0: i32) -> (i32, i32) {
    %c0_i32 = arith.constant 0 : i32
    %c0_i32_0 = arith.constant 0 : i32
    %c0_i32_1 = arith.constant 0 : i32
    return %c0_i32, %c0_i32_0 : i32, i32
  }
  func.func @transform_5(%arg0: i32) -> (i32, i32) {
    %c0_i32 = arith.constant 0 : i32
    %c0_i32_0 = arith.constant 0 : i32
    %c0_i32_1 = arith.constant 0 : i32
    return %c0_i32, %c0_i32_0 : i32, i32
  }
  func.func @transform_6(%arg0: i32) -> (i32, i32) {
    %c0_i32 = arith.constant 0 : i32
    %c0_i32_0 = arith.constant 0 : i32
    %c0_i32_1 = arith.constant 0 : i32
    return %c0_i32, %c0_i32_0 : i32, i32
  }
  func.func @transform_7(%arg0: i32) -> (i32, i32) {
    %c0_i32 = arith.constant 0 : i32
    %c0_i32_0 = arith.constant 0 : i32
    %c0_i32_1 = arith.constant 0 : i32
    return %c0_i32, %c0_i32_0 : i32, i32
  }
  func.func @transform_8(%arg0: i32) -> (i32, i32) {
    %c0_i32 = arith.constant 0 : i32
    %c0_i32_0 = arith.constant 0 : i32
    %c0_i32_1 = arith.constant 0 : i32
    return %c0_i32, %c0_i32_0 : i32, i32
  }
  func.func @transform_9(%arg0: i32) -> (i32, i32, i32) {
    %c0_i32 = arith.constant 0 : i32
    %c0_i32_0 = arith.constant 0 : i32
    %c0_i32_1 = arith.constant 0 : i32
    return %arg0, %c0_i32, %c0_i32_0 : i32, i32, i32
  }
}

</mosaic_0001>

<bundles_post_ra>
// kernel: tpu_custom_call.1
= control target key start
LH: loop header
LB: loop body
LE: loop exit
PB: predicated region body
PF: predicated region fallthrough
CT: control target
= control target key end

     0   :  { %s1586_s30 = smov 0   ;;  %s2030_s0 = inlined_call_operand.vmem [shape: f32[2,63,16], index: 0, kind: input, shape index: {}]   ;;  %s2031_s1 = inlined_call_operand.vmem [shape: f32[16,256], index: 1, kind: input, shape index: {}]   ;;  %s2032_s2 = inlined_call_operand.vmem [shape: f32[1,128], index: 2, kind: input, shape index: {}]   ;;  %s2033_s3 = inlined_call_operand.vmem [shape: f32[512,128], index: 3, kind: input, shape index: {}]   ;;  %s2034_s4 = inlined_call_operand.vmem [shape: f32[1,64], index: 4, kind: input, shape index: {}]   ;;  %s2035_s5 = inlined_call_operand.vmem [shape: f32[256,64], index: 5, kind: input, shape index: {}]   ;;  %s2036_s6 = inlined_call_operand.vmem [shape: f32[1,32], index: 6, kind: input, shape index: {}]   ;;  %s2037_s7 = inlined_call_operand.vmem [shape: f32[128,32], index: 7, kind: input, shape index: {}]   ;;  %s2038_s8 = inlined_call_operand.vmem [shape: f32[1,16], index: 8, kind: input, shape index: {}]   ;;  %s2039_s9 = inlined_call_operand.vmem [shape: f32[2,6,16], index: 9, kind: output, shape index: {}]  }
   0x1 LB: > { %s1171_s10 = sadd.s32 4294967295, %s1527_s30   ;;  %p1175_p0 = scmp.ge.s32.totalorder %s1527_s30, 1  ;;  %s1527_s30 = sphi %s1586_s30, %s19_s30  }
   0x2   : > { %p287_p1 = scmp.lt.s32.totalorder %s1527_s30, 3 }
   0x4   : > { %p288_p2 = pnand %p1175_p0, %p287_p1 }
   0x5   : > { %v340_v0 = vld [vmem:[%s2031_s1 + $0x8] sm:$0xff] (!%p288_p2)  ;;  %v342_v1 = vld [vmem:[%s2031_s1 + $0x18] sm:$0xff] (!%p288_p2)  ;;  %v339_v2 = vld [vmem:[%s2031_s1] sm:$0xff] (!%p288_p2)  ;;  %p322_p3 = scmp.lt.s32.totalorder (!%p288_p2), %s1171_s10, 1  ;;  %v1529_v5 = vmov (!%p288_p2), 0.0   ;;  %vm343_vm0 = vcmask (!%p288_p2), 130048  }
   0x6   : > { %291 = sbr.rel (%p288_p2) target bundleno = 1540 (0x604), region = 56  ;;  %v1372_v3 = vpack.c.bf16 (!%p288_p2), %v342_v1, %v340_v0  ;;  %v341_v4 = vld [vmem:[%s2031_s1 + $0x10] sm:$0xff] (!%p288_p2)  ;;  %432 = vmatprep.mubr.f32.mxu0 (!%p288_p2), %v1529_v5  ;;  %v567_v6 = vld [vmem:[%s2033_s3 + $0x80] sm:$0xff] (!%p288_p2)  ;;  %v568_v7 = vld [vmem:[%s2033_s3 + $0x88] sm:$0xff] (!%p288_p2)  ;;  %s1530_s20 = smov (!%p288_p2), 64   ;;  %vm820_vm1 = vcmask (!%p288_p2), 523264  }
   0x7   : > { %v1374_v8 = vpack.c.bf16 (!%p288_p2), %v341_v4, %v339_v2  ;;  %v1376_v9 = vpack.c.bf16 (!%p288_p2), %v568_v7, %v567_v6  ;;  %v551_v10 = vld [vmem:[%s2033_s3] sm:$0xff] (!%p288_p2)  ;;  %v552_v11 = vld [vmem:[%s2033_s3 + $0x8] sm:$0xff] (!%p288_p2)  ;;  %v569_v12 = vld [vmem:[%s2033_s3 + $0x90] sm:$0xff] (!%p288_p2)  ;;  %vm824_vm2 = vcmask (!%p288_p2), 521216   ;;  %vm989_vm3 = vcmask (!%p288_p2), 261120   ;;  %s1534_s15 = smov (!%p288_p2), 32  }
   0x8   : > { %1373 = vmatprep.subr.bf16.mxu0 (!%p288_p2), %v1372_v3  ;;  %v1378_v13 = vpack.c.bf16 (!%p288_p2), %v552_v11, %v551_v10  ;;  %v570_v14 = vld [vmem:[%s2033_s3 + $0x98] sm:$0xff] (!%p288_p2)  ;;  %v599_v15 = vld [vmem:[%s2033_s3 + $0x180] sm:$0xff] (!%p288_p2)  ;;  %v600_v16 = vld [vmem:[%s2033_s3 + $0x188] sm:$0xff] (!%p288_p2)  ;;  %vm991_vm4 = vcmask (!%p288_p2), 259072   ;;  %vm1533_vm5 = vmmov (!%p288_p2), 0   ;;  %vm1014_vm6 = vcmask (!%p288_p2), 785408  }
   0x9   : > { %1375 = vmatpush1.bf16.msra.mxu0 (!%p288_p2), %v1374_v8  ;;  %1377 = vmatprep.subr.bf16.mxu1 (!%p288_p2), %v1376_v9  ;;  %v1380_v17 = vpack.c.bf16 (!%p288_p2), %v570_v14, %v569_v12  ;;  %v1408_v18 = vpack.c.bf16 (!%p288_p2), %v600_v16, %v599_v15  ;;  %v553_v19 = vld [vmem:[%s2033_s3 + $0x10] sm:$0xff] (!%p288_p2)  ;;  %v554_v20 = vld [vmem:[%s2033_s3 + $0x18] sm:$0xff] (!%p288_p2)  ;;  %v583_v21 = vld [vmem:[%s2033_s3 + $0x100] sm:$0xff] (!%p288_p2)  ;;  %vm1116_vm7 = vcmask (!%p288_p2), 128000  }
   0xa   : > { %1379 = vmatpush3.bf16.msra.mxu1 (!%p288_p2), %v1378_v13  ;;  %v1382_v22 = vpack.c.bf16 (!%p288_p2), %v554_v20, %v553_v19  ;;  %v584_v23 = vld [vmem:[%s2033_s3 + $0x108] sm:$0xff] (!%p288_p2)  ;;  %v571_v24 = vld [vmem:[%s2033_s3 + $0xa0] sm:$0xff] (!%p288_p2)  ;;  %v601_v30 = vld [vmem:[%s2033_s3 + $0x190] sm:$0xff] (!%p288_p2) }
   0xb   : > { %v572_v25 = vld [vmem:[%s2033_s3 + $0xa8] sm:$0xff] (!%p288_p2)  ;;  %1381 = vmatprep.subr.bf16.mxu1 (!%p288_p2), %v1380_v17  ;;  %1409 = vmatprep.subr.bf16.mxu0 (!%p288_p2), %v1408_v18  ;;  %v1410_v27 = vpack.c.bf16 (!%p288_p2), %v584_v23, %v583_v21  ;;  %v602_v31 = vld [vmem:[%s2033_s3 + $0x198] sm:$0xff] (!%p288_p2)  ;;  %v555_v32 = vld [vmem:[%s2033_s3 + $0x20] sm:$0xff] (!%p288_p2) }
   0xc   : > { %v1384_v28 = vpack.c.bf16 (!%p288_p2), %v572_v25, %v571_v24  ;;  %v556_v33 = vld [vmem:[%s2033_s3 + $0x28] sm:$0xff] (!%p288_p2)  ;;  %v1412_v34 = vpack.c.bf16 (!%p288_p2), %v602_v31, %v601_v30  ;;  %v585_v36 = vld [vmem:[%s2033_s3 + $0x110] sm:$0xff] (!%p288_p2)  ;;  %v586_v37 = vld [vmem:[%s2033_s3 + $0x118] sm:$0xff] (!%p288_p2) }
   0xd   : > { %s2041_s10 = smov (!%p322_p3, %s1171_s10), 1  ;;  %v1386_v35 = vpack.c.bf16 %v556_v33, %v555_v32  ;;  %v1414_v38 = vpack.c.bf16 %v586_v37, %v585_v36  ;;  %v573_v45 = vld [vmem:[%s2033_s3 + $0xb0] sm:$0xff]  ;;  %v574_v46 = vld [vmem:[%s2033_s3 + $0xb8] sm:$0xff]  ;;  %v603_v47 = vld [vmem:[%s2033_s3 + $0x1a0] sm:$0xff] }
   0xe   : > { %s1193_s16 = sshll.u32 %s2041_s10, 6  ;;  %1383 = vmatpush3.bf16.msra.mxu1 %v1382_v22  ;;  %v1388_v48 = vpack.c.bf16 %v574_v46, %v573_v45  ;;  %v604_v49 = vld [vmem:[%s2033_s3 + $0x1a8] sm:$0xff]  ;;  %v557_v50 = vld [vmem:[%s2033_s3 + $0x30] sm:$0xff]  ;;  %v558_v51 = vld [vmem:[%s2033_s3 + $0x38] sm:$0xff] }
   0xf   : > { %s1646_s25 = scalar_lea.vmem %s2030_s0, %s1193_s16  ;;  %1385 = vmatprep.subr.bf16.mxu1 %v1384_v28  ;;  %v1416_v52 = vpack.c.bf16 %v604_v49, %v603_v47  ;;  %v1390_v53 = vpack.c.bf16 %v558_v51, %v557_v50  ;;  %v587_v54 = vld [vmem:[%s2033_s3 + $0x120] sm:$0xff]  ;;  %v588_v55 = vld [vmem:[%s2033_s3 + $0x128] sm:$0xff]  ;;  %v605_v60 = vld [vmem:[%s2033_s3 + $0x1b0] sm:$0xff]  ;;  %s1535_s16 = smov 112  }
  0x10   : > { %v331_v26 = vld [vmem:[%s1646_s25] sm:$0xff]  ;;  %v332_v29 = vld [vmem:[%s1646_s25 + $0x8] sm:$0xff]  ;;  %v333_v39 = vld [vmem:[%s1646_s25 + $0x10] sm:$0xff]  ;;  %v1418_v56 = vpack.c.bf16 %v588_v55, %v587_v54 }
  0x11   : > { %1179 = vmatmul.mubr.msk.f32.vlgmr.msra.gmra.mrb[0].mxu0 %vm343_vm0, %v331_v26  ;;  %v334_v40 = vld [vmem:[%s1646_s25 + $0x18] sm:$0xff]  ;;  %v335_v41 = vld [vmem:[%s1646_s25 + $0x20] sm:$0xff]  ;;  %v336_v42 = vld [vmem:[%s1646_s25 + $0x28] sm:$0xff] }
  0x12   : > { %438 = vmatprep.mubr.f32.mxu0 %v1529_v5  ;;  %1411 = vmatpush3.bf16.msra.mxu0 %v1410_v27  ;;  %v337_v43 = vld [vmem:[%s1646_s25 + $0x30] sm:$0xff]  ;;  %v338_v44 = vld [vmem:[%s1646_s25 + $0x38] sm:$0x7f]  ;;  %v575_v57 = vld [vmem:[%s2033_s3 + $0xc0] sm:$0xff]  ;;  %s1531_s25 = smov 96  }
  0x13   : > { %1413 = vmatprep.subr.bf16.mxu0 %v1412_v34  ;;  %1387 = vmatpush3.bf16.msra.mxu1 %v1386_v35  ;;  %v576_v58 = vld [vmem:[%s2033_s3 + $0xc8] sm:$0xff]  ;;  %v606_v61 = vld [vmem:[%s2033_s3 + $0x1b8] sm:$0xff]  ;;  %v559_v62 = vld [vmem:[%s2033_s3 + $0x40] sm:$0xff] }
  0x14   : > { %1389 = vmatprep.subr.bf16.mxu1 %v1388_v48  ;;  %v1392_v59 = vpack.c.bf16 %v576_v58, %v575_v57  ;;  %v1420_v63 = vpack.c.bf16 %v606_v61, %v605_v60  ;;  %v560_v0 = vld [vmem:[%s2033_s3 + $0x48] sm:$0xff]  ;;  %v589_v1 = vld [vmem:[%s2033_s3 + $0x130] sm:$0xff]  ;;  %v590_v2 = vld [vmem:[%s2033_s3 + $0x138] sm:$0xff] }
  0x15   : > { %1180 = vmatmul.mubr.msk.f32.gmra.mrb[2].mxu0 %vm343_vm0, %v332_v29  ;;  %v1394_v3 = vpack.c.bf16 %v560_v0, %v559_v62  ;;  %v1422_v4 = vpack.c.bf16 %v590_v2, %v589_v1  ;;  %v577_v6 = vld [vmem:[%s2033_s3 + $0xd0] sm:$0xff]  ;;  %v578_v7 = vld [vmem:[%s2033_s3 + $0xd8] sm:$0xff]  ;;  %v607_v8 = vld [vmem:[%s2033_s3 + $0x1c0] sm:$0xff] }
  0x16   : > { %444 = vmatprep.mubr.f32.mxu0 %v1529_v5  ;;  %1415 = vmatpush3.bf16.msra.mxu0 %v1414_v38  ;;  %v1396_v9 = vpack.c.bf16 %v578_v7, %v577_v6  ;;  %v608_v10 = vld [vmem:[%s2033_s3 + $0x1c8] sm:$0xff]  ;;  %v561_v11 = vld [vmem:[%s2033_s3 + $0x50] sm:$0xff]  ;;  %v562_v12 = vld [vmem:[%s2033_s3 + $0x58] sm:$0xff] }
  0x17   : > { %1417 = vmatprep.subr.bf16.mxu0 %v1416_v52  ;;  %1391 = vmatpush3.bf16.msra.mxu1 %v1390_v53  ;;  %v1424_v13 = vpack.c.bf16 %v608_v10, %v607_v8  ;;  %v1398_v14 = vpack.c.bf16 %v562_v12, %v561_v11  ;;  %v591_v15 = vld [vmem:[%s2033_s3 + $0x140] sm:$0xff]  ;;  %v592_v16 = vld [vmem:[%s2033_s3 + $0x148] sm:$0xff]  ;;  %v609_v20 = vld [vmem:[%s2033_s3 + $0x1d0] sm:$0xff] }
  0x18   : > { %1393 = vmatprep.subr.bf16.mxu1 %v1392_v59  ;;  %v1426_v17 = vpack.c.bf16 %v592_v16, %v591_v15  ;;  %v579_v18 = vld [vmem:[%s2033_s3 + $0xe0] sm:$0xff]  ;;  %v580_v19 = vld [vmem:[%s2033_s3 + $0xe8] sm:$0xff]  ;;  %v610_v22 = vld [vmem:[%s2033_s3 + $0x1d8] sm:$0xff] }
  0x19   : > { %1181 = vmatmul.mubr.msk.f32.gmra.mrb[4].mxu0 %vm343_vm0, %v333_v39  ;;  %v1400_v21 = vpack.c.bf16 %v580_v19, %v579_v18  ;;  %v563_v23 = vld [vmem:[%s2033_s3 + $0x60] sm:$0xff]  ;;  %v564_v24 = vld [vmem:[%s2033_s3 + $0x68] sm:$0xff]  ;;  %v1428_v25 = vpack.c.bf16 %v610_v22, %v609_v20  ;;  %v593_v27 = vld [vmem:[%s2033_s3 + $0x150] sm:$0xff] }
  0x1a   : > { %450 = vmatprep.mubr.f32.mxu0 %v1529_v5  ;;  %1419 = vmatpush3.bf16.msra.mxu0 %v1418_v56  ;;  %v1402_v26 = vpack.c.bf16 %v564_v24, %v563_v23  ;;  %v594_v28 = vld [vmem:[%s2033_s3 + $0x158] sm:$0xff]  ;;  %v581_v30 = vld [vmem:[%s2033_s3 + $0xf0] sm:$0xff]  ;;  %v611_v32 = vld [vmem:[%s2033_s3 + $0x1e0] sm:$0xff] }
  0x1b   : > { %1421 = vmatprep.subr.bf16.mxu0 %v1420_v63  ;;  %1395 = vmatpush3.bf16.msra.mxu1 %v1394_v3  ;;  %v1430_v29 = vpack.c.bf16 %v594_v28, %v593_v27  ;;  %v582_v31 = vld [vmem:[%s2033_s3 + $0xf8] sm:$0xff]  ;;  %v612_v34 = vld [vmem:[%s2033_s3 + $0x1e8] sm:$0xff]  ;;  %v565_v35 = vld [vmem:[%s2033_s3 + $0x70] sm:$0xff] }
  0x1c   : > { %1397 = vmatprep.subr.bf16.mxu1 %v1396_v9  ;;  %v1404_v33 = vpack.c.bf16 %v582_v31, %v581_v30  ;;  %v566_v36 = vld [vmem:[%s2033_s3 + $0x78] sm:$0xff]  ;;  %v1432_v37 = vpack.c.bf16 %v612_v34, %v611_v32  ;;  %v595_v39 = vld [vmem:[%s2033_s3 + $0x160] sm:$0xff]  ;;  %v597_v45 = vld [vmem:[%s2033_s3 + $0x170] sm:$0xff] }
  0x1d   : > { %1182 = vmatmul.mubr.msk.f32.gmra.mrb[6].mxu0 %vm343_vm0, %v334_v40  ;;  %v1406_v38 = vpack.c.bf16 %v566_v36, %v565_v35  ;;  %v596_v40 = vld [vmem:[%s2033_s3 + $0x168] sm:$0xff]  ;;  %v598_v46 = vld [vmem:[%s2033_s3 + $0x178] sm:$0xff]  ;;  %v1187_v50 = vld [vmem:[%s2032_s2] ss:$0 sm:$0xff] }
  0x1e   : > { %456 = vmatprep.mubr.f32.mxu0 %v1529_v5  ;;  %1423 = vmatpush3.bf16.msra.mxu0 %v1422_v4  ;;  %v1438_v47 = vpack.c.bf16 %v598_v46, %v597_v45 }
  0x1f   : > { %1425 = vmatprep.subr.bf16.mxu0 %v1424_v13  ;;  %1399 = vmatpush3.bf16.msra.mxu1 %v1398_v14 }
  0x20   : > { %1401 = vmatprep.subr.bf16.mxu1 %v1400_v21 }
  0x21   : > { %1183 = vmatmul.mubr.msk.f32.gmra.mrb[8].mxu0 %vm343_vm0, %v335_v41  ;;  %v1434_v41 = vpack.c.bf16 %v596_v40, %v595_v39 }
  0x22   : > { %462 = vmatprep.mubr.f32.mxu0 %v1529_v5  ;;  %1427 = vmatpush3.bf16.msra.mxu0 %v1426_v17 }
  0x23   : > { %1429 = vmatprep.subr.bf16.mxu0 %v1428_v25  ;;  %1403 = vmatpush3.bf16.msra.mxu1 %v1402_v26 }
  0x24   : > { %1405 = vmatprep.subr.bf16.mxu1 %v1404_v33 }
  0x25   : > { %1184 = vmatmul.mubr.msk.f32.gmra.mrb[10].mxu0 %vm343_vm0, %v336_v42  ;;  %v613_v42 = vld [vmem:[%s2033_s3 + $0x1f0] sm:$0xff] }
  0x26   : > { %468 = vmatprep.mubr.f32.mxu0 %v1529_v5  ;;  %1431 = vmatpush3.bf16.msra.mxu0 %v1430_v29 }
  0x27   : > { %1433 = vmatprep.subr.bf16.mxu0 %v1432_v37  ;;  %1407 = vmatpush3.bf16.msra.mxu1 %v1406_v38 }
  0x29   : > { %1185 = vmatmul.mubr.msk.f32.gmra.mrb[12].mxu0 %vm343_vm0, %v337_v43  ;;  %v614_v43 = vld [vmem:[%s2033_s3 + $0x1f8] sm:$0xff] }
  0x2a   : > { %474 = vmatprep.mubr.f32.mxu0 %v1529_v5  ;;  %1435 = vmatpush3.bf16.msra.mxu0 %v1434_v41 }
  0x2d   : > { %1186 = vmatmul.mubr.msk.f32.gmra.mrb[14].mxu0 %vm343_vm0, %v338_v44  ;;  %v1436_v44 = vpack.c.bf16 %v614_v43, %v613_v42 }
  0x2f   : > { %1437 = vmatprep.subr.bf16.mxu0 %v1436_v44 }
  0x30   : > { %1439 = vmatpush3.bf16.msra.mxu0 %v1438_v47 }
  0xe4   : > { %v434_v48 = vpop.f32.mrb[0].mxu0 }
  0xe5   : > { %v436_v49 = vpop.f32.mrb[1].mxu0 }
  0xe6   : > { %v481_v51 = vmax.f32 %v434_v48, %v436_v49 }
  0xe8   : > { %v496_v52 = vadd.f32 %v1187_v50, %v481_v51  ;;  %v440_v53 = vpop.f32.mrb[2].mxu0 }
  0xe9   : > { %v442_v54 = vpop.f32.mrb[3].mxu0 }
  0xea   : > { %v504_v55 = vmax.f32 %v496_v52, 0.0  ;;  %v482_v56 = vmax.f32 %v440_v53, %v442_v54 }
  0xec   : > { %512 = vst [vmem:[#allocation2] sm:$0xff] %v504_v55  ;;  %v497_v57 = vadd.f32 %v1187_v50, %v482_v56  ;;  %v446_v58 = vpop.f32.mrb[4].mxu0 }
  0xed   : > { %v448_v59 = vpop.f32.mrb[5].mxu0 }
  0xee   : > { %v505_v60 = vmax.f32 %v497_v57, 0.0  ;;  %v483_v61 = vmax.f32 %v446_v58, %v448_v59 }
  0xf0   : > { %513 = vst [vmem:[#allocation2 + $0x8] sm:$0xff] %v505_v60  ;;  %v498_v62 = vadd.f32 %v1187_v50, %v483_v61  ;;  %v452_v63 = vpop.f32.mrb[6].mxu0 }
  0xf1   : > { %v454_v0 = vpop.f32.mrb[7].mxu0 }
  0xf2   : > { %v506_v1 = vmax.f32 %v498_v62, 0.0  ;;  %v484_v2 = vmax.f32 %v452_v63, %v454_v0 }
  0xf4   : > { %514 = vst [vmem:[#allocation2 + $0x10] sm:$0xff] %v506_v1  ;;  %v499_v3 = vadd.f32 %v1187_v50, %v484_v2  ;;  %v458_v4 = vpop.f32.mrb[8].mxu0 }
  0xf5   : > { %v460_v6 = vpop.f32.mrb[9].mxu0 }
  0xf6   : > { %v507_v7 = vmax.f32 %v499_v3, 0.0  ;;  %v485_v8 = vmax.f32 %v458_v4, %v460_v6 }
  0xf7   : > { %v528_v9 = vld [vmem:[#allocation2 + $0x1] ss:$2 sm:$0xff]  ;;  %v520_v10 = vld [vmem:[#allocation2] ss:$2 sm:$0xff] }
  0xf8   : > { %515 = vst [vmem:[#allocation2 + $0x18] sm:$0xff] %v507_v7  ;;  %v500_v11 = vadd.f32 %v1187_v50, %v485_v8  ;;  %v464_v12 = vpop.f32.mrb[10].mxu0  ;;  %679 = vmatprep.mubr.f32.mxu1 %v528_v9  ;;  %v877_v7 = vld [vmem:[%s2035_s5 + $0x80] sm:$0xff]  ;;  %v878_v8 = vld [vmem:[%s2035_s5 + $0x88] sm:$0xff] }
  0xf9   : > { %v466_v13 = vpop.f32.mrb[11].mxu0  ;;  %680 = vmatmul.mubr.f32.vlgmr.msra.gmra.mrb[0].mxu1 %v520_v10  ;;  %v861_v9 = vld [vmem:[%s2035_s5] sm:$0xff]  ;;  %v1440_v10 = vpack.c.bf16 %v878_v8, %v877_v7 }
  0xfa   : > { %v508_v14 = vmax.f32 %v500_v11, 0.0  ;;  %v486_v15 = vmax.f32 %v464_v12, %v466_v13  ;;  %v862_v11 = vld [vmem:[%s2035_s5 + $0x8] sm:$0xff]  ;;  %v879_v12 = vld [vmem:[%s2035_s5 + $0x90] sm:$0xff]  ;;  %v880_v13 = vld [vmem:[%s2035_s5 + $0x98] sm:$0xff] }
  0xfb   : > { %v544_v16 = vld [vmem:[#allocation2 + $0x3] ss:$2 sm:$0xff]  ;;  %v536_v17 = vld [vmem:[#allocation2 + $0x2] ss:$2 sm:$0xff]  ;;  %1441 = vmatprep.subr.bf16.mxu1 %v1440_v10 }
  0xfc   : > { %516 = vst [vmem:[#allocation2 + $0x20] sm:$0xff] %v508_v14  ;;  %v501_v18 = vadd.f32 %v1187_v50, %v486_v15  ;;  %v470_v19 = vpop.f32.mrb[12].mxu0  ;;  %764 = vmatprep.mubr.f32.mxu0 %v544_v16  ;;  %v1442_v14 = vpack.c.bf16 %v862_v11, %v861_v9  ;;  %v1444_v15 = vpack.c.bf16 %v880_v13, %v879_v12  ;;  %v863_v16 = vld [vmem:[%s2035_s5 + $0x10] sm:$0xff] }
  0xfd   : > { %v472_v20 = vpop.f32.mrb[13].mxu0  ;;  %765 = vmatmul.mubr.f32.vlgmr.msra.gmra.mrb[16].mxu0 %v536_v17  ;;  %v864_v17 = vld [vmem:[%s2035_s5 + $0x18] sm:$0xff] }
  0xfe   : > { %v509_v21 = vmax.f32 %v501_v18, 0.0  ;;  %v487_v22 = vmax.f32 %v470_v19, %v472_v20  ;;  %v881_v18 = vld [vmem:[%s2035_s5 + $0xa0] sm:$0xff]  ;;  %v882_v19 = vld [vmem:[%s2035_s5 + $0xa8] sm:$0xff]  ;;  %1443 = vmatpush3.bf16.msra.mxu1 %v1442_v14  ;;  %v1446_v20 = vpack.c.bf16 %v864_v17, %v863_v16 }
  0xff   : > { %v530_v23 = vld [vmem:[#allocation2 + $0x11] ss:$2 sm:$0xff]  ;;  %v522_v24 = vld [vmem:[#allocation2 + $0x10] ss:$2 sm:$0xff]  ;;  %1445 = vmatprep.subr.bf16.mxu1 %v1444_v15 }
 0x100   : > { %517 = vst [vmem:[#allocation2 + $0x28] sm:$0xff] %v509_v21  ;;  %v502_v25 = vadd.f32 %v1187_v50, %v487_v22  ;;  %v476_v26 = vpop.f32.mrb[14].mxu0  ;;  %684 = vmatprep.mubr.f32.mxu1 %v530_v23  ;;  %v1448_v21 = vpack.c.bf16 %v882_v19, %v881_v18  ;;  %v865_v22 = vld [vmem:[%s2035_s5 + $0x20] sm:$0xff]  ;;  %v866_v23 = vld [vmem:[%s2035_s5 + $0x28] sm:$0xff] }
 0x101   : > { %v478_v27 = vpop.f32.mrb[15].mxu0  ;;  %685 = vmatmul.mubr.f32.gmra.mrb[2].mxu1 %v522_v24  ;;  %v883_v24 = vld [vmem:[%s2035_s5 + $0xb0] sm:$0xff] }
 0x102   : > { %v510_v28 = vmax.f32 %v502_v25, 0.0  ;;  %v488_v29 = vmax.f32 %v476_v26, %v478_v27  ;;  %v884_v25 = vld [vmem:[%s2035_s5 + $0xb8] sm:$0xff]  ;;  %1447 = vmatpush3.bf16.msra.mxu1 %v1446_v20  ;;  %v1450_v26 = vpack.c.bf16 %v866_v23, %v865_v22 }
 0x103   : > { %v546_v30 = vld [vmem:[#allocation2 + $0x13] ss:$2 sm:$0xff]  ;;  %v538_v31 = vld [vmem:[#allocation2 + $0x12] ss:$2 sm:$0xff]  ;;  %1449 = vmatprep.subr.bf16.mxu1 %v1448_v21  ;;  %v1452_v27 = vpack.c.bf16 %v884_v25, %v883_v24 }
 0x104   : > { %518 = vst [vmem:[#allocation2 + $0x30] sm:$0xff] %v510_v28  ;;  %v503_v32 = vadd.f32 %v1187_v50, %v488_v29  ;;  %769 = vmatprep.mubr.f32.mxu0 %v546_v30  ;;  %v867_v28 = vld [vmem:[%s2035_s5 + $0x30] sm:$0xff]  ;;  %v868_v29 = vld [vmem:[%s2035_s5 + $0x38] sm:$0xff]  ;;  %v885_v30 = vld [vmem:[%s2035_s5 + $0xc0] sm:$0xff] }
 0x105   : > { %770 = vmatmul.mubr.f32.gmra.mrb[18].mxu0 %v538_v31  ;;  %v886_v31 = vld [vmem:[%s2035_s5 + $0xc8] sm:$0xff] }
 0x106   : > { %v511_v33 = vmax.f32 %v503_v32, 0.0  ;;  %1451 = vmatpush3.bf16.msra.mxu1 %v1450_v26  ;;  %v1454_v32 = vpack.c.bf16 %v868_v29, %v867_v28 }
 0x107   : > { %v532_v34 = vld [vmem:[#allocation2 + $0x21] ss:$2 sm:$0xff]  ;;  %v524_v35 = vld [vmem:[#allocation2 + $0x20] ss:$2 sm:$0xff]  ;;  %1453 = vmatprep.subr.bf16.mxu1 %v1452_v27 }
 0x108   : > { %519 = vst [vmem:[#allocation2 + $0x38] sm:$0x7f] %v511_v33  ;;  %689 = vmatprep.mubr.f32.mxu1 %v532_v34  ;;  %v1456_v33 = vpack.c.bf16 %v886_v31, %v885_v30  ;;  %v869_v34 = vld [vmem:[%s2035_s5 + $0x40] sm:$0xff] }
 0x109   : > { %690 = vmatmul.mubr.f32.gmra.mrb[4].mxu1 %v524_v35  ;;  %v870_v35 = vld [vmem:[%s2035_s5 + $0x48] sm:$0xff] }
 0x10a   : > { %1455 = vmatpush3.bf16.msra.mxu1 %v1454_v32 }
 0x10b   : > { %v548_v36 = vld [vmem:[#allocation2 + $0x23] ss:$2 sm:$0xff]  ;;  %v540_v37 = vld [vmem:[#allocation2 + $0x22] ss:$2 sm:$0xff]  ;;  %1457 = vmatprep.subr.bf16.mxu1 %v1456_v33 }
 0x10c   : > { %774 = vmatprep.mubr.f32.mxu0 %v548_v36  ;;  %v887_v36 = vld [vmem:[%s2035_s5 + $0xd0] sm:$0xff] }
 0x10d   : > { %775 = vmatmul.mubr.f32.gmra.mrb[20].mxu0 %v540_v37  ;;  %v888_v37 = vld [vmem:[%s2035_s5 + $0xd8] sm:$0xff] }
 0x10f   : > { %v534_v38 = vld [vmem:[#allocation2 + $0x31] ss:$2 sm:$0x3f]  ;;  %v526_v40 = vld [vmem:[#allocation2 + $0x30] ss:$2 sm:$0x3f] }
 0x110   : > { %v550_v39 = vld [vmem:[#allocation2 + $0x33] ss:$2 sm:$0x3f]  ;;  %694 = vmatprep.mubr.f32.mxu1 %v534_v38  ;;  %v542_v41 = vld [vmem:[#allocation2 + $0x32] ss:$2 sm:$0x3f]  ;;  %v1458_v38 = vpack.c.bf16 %v870_v35, %v869_v34 }
 0x111   : > { %779 = vmatprep.mubr.f32.mxu0 %v550_v39  ;;  %695 = vmatmul.mubr.f32.gmra.mrb[6].mxu1 %v526_v40  ;;  %v1460_v39 = vpack.c.bf16 %v888_v37, %v887_v36  ;;  %v871_v40 = vld [vmem:[%s2035_s5 + $0x50] sm:$0xff]  ;;  %v1016_v35 = vld [vmem:[%s2037_s7] sm:$0xff]  ;;  %v1017_v36 = vld [vmem:[%s2037_s7 + $0x8] sm:$0xff] }
 0x112   : > { %780 = vmatmul.mubr.f32.gmra.mrb[22].mxu0 %v542_v41  ;;  %v872_v41 = vld [vmem:[%s2035_s5 + $0x58] sm:$0xff]  ;;  %1459 = vmatpush3.bf16.msra.mxu1 %v1458_v38  ;;  %v1018_v37 = vld [vmem:[%s2037_s7 + $0x10] sm:$0xff]  ;;  %v1532_v38 = vmov 0.0|0.0  }
 0x113   : > { %1461 = vmatprep.subr.bf16.mxu1 %v1460_v39  ;;  %1472 = vmatprep.subr.bf16.mxu0 %v1532_v38  ;;  %v1473_v39 = vpack.c.bf16 %v1017_v36, %v1016_v35 }
 0x114   : > { %1369 = vmatprep.mubr.msk.f32.mxu0 %vm1533_vm5, %v1529_v5 }
 0x115   : > { %1474 = vmatpush3.bf16.msra.mxu0 %v1473_v39 }
 0x116   : > { %1475 = vmatprep.subr.bf16.mxu0 %v1532_v38 }
 0x1cc   : > { %v1226_v42 = vpop.f32.mrb[0].mxu1 }
 0x1cd   : > { %v1227_v43 = vpop.f32.mrb[1].mxu1 }
 0x1ce   : > { %v1228_v44 = vadd.f32 %v1227_v43, %v1226_v42  ;;  %v889_v42 = vld [vmem:[%s2035_s5 + $0xe0] sm:$0xff]  ;;  %v890_v43 = vld [vmem:[%s2035_s5 + $0xe8] sm:$0xff] }
 0x1d0   : > { %v1270_v45 = vpop.f32.mrb[16].mxu0 }
 0x1d1   : > { %v1271_v46 = vpop.f32.mrb[17].mxu0 }
 0x1d2   : > { %v1272_v47 = vadd.f32 %v1271_v46, %v1270_v45  ;;  %v1464_v45 = vpack.c.bf16 %v890_v43, %v889_v42  ;;  %v873_v46 = vld [vmem:[%s2035_s5 + $0x60] sm:$0xff]  ;;  %v1021_v43 = vld [vmem:[%s2037_s7 + $0x28] sm:$0xff] }
 0x1d3   : > { %v1020_v42 = vld [vmem:[%s2037_s7 + $0x20] sm:$0xff] }
 0x1d4   : > { %v1229_v48 = vpop.f32.mrb[2].mxu1  ;;  %v1833_v49 = vadd.f32 %v1272_v47, %v1228_v44  ;;  %v1462_v44 = vpack.c.bf16 %v872_v41, %v871_v40  ;;  %v874_v47 = vld [vmem:[%s2035_s5 + $0x68] sm:$0xff]  ;;  %v1019_v40 = vld [vmem:[%s2037_s7 + $0x18] sm:$0xff] }
 0x1d5   : > { %v1230_v50 = vpop.f32.mrb[3].mxu1  ;;  %v1476_v41 = vpack.c.bf16 %v1019_v40, %v1018_v37 }
 0x1d6   : > { %v1231_v51 = vadd.f32 %v1230_v50, %v1229_v48  ;;  %789 = vrot.lane.b32.xlu0 %v1833_v49, %s1530_s20  ;;  %1463 = vmatpush3.bf16.msra.mxu1 %v1462_v44  ;;  %v1466_v48 = vpack.c.bf16 %v874_v47, %v873_v46  ;;  %v1188_v50 = vld [vmem:[%s2034_s4] ss:$0 sm:$0xff]  ;;  %v1479_v44 = vpack.c.bf16 %v1021_v43, %v1020_v42  ;;  %v1023_v46 = vld [vmem:[%s2037_s7 + $0x38] sm:$0xff] }
 0x1d7   : > { %1465 = vmatprep.subr.bf16.mxu1 %v1464_v45  ;;  %1477 = vmatpush3.bf16.msra.mxu0 %v1476_v41  ;;  %v1022_v45 = vld [vmem:[%s2037_s7 + $0x30] sm:$0xff] }
 0x1d8   : > { %v1273_v52 = vpop.f32.mrb[18].mxu0  ;;  %1478 = vmatprep.subr.bf16.mxu0 %v1532_v38  ;;  %v1482_v47 = vpack.c.bf16 %v1023_v46, %v1022_v45 }
 0x1d9   : > { %v1274_v53 = vpop.f32.mrb[19].mxu0 }
 0x1da   : > { %v1275_v54 = vadd.f32 %v1274_v53, %v1273_v52  ;;  %1467 = vmatpush3.bf16.msra.mxu1 %v1466_v48  ;;  %v1024_v48 = vld [vmem:[%s2037_s7 + $0x40] sm:$0xff] }
 0x1db   : > { %1480 = vmatpush3.bf16.msra.mxu0 %v1479_v44 }
 0x1dc   : > { %v1837_v55 = vadd.f32 %v1275_v54, %v1231_v51  ;;  %v1232_v56 = vpop.f32.mrb[4].mxu1  ;;  %1481 = vmatprep.subr.bf16.mxu0 %v1532_v38 }
 0x1dd   : > { %v1233_v57 = vpop.f32.mrb[5].mxu1 }
 0x1de   : > { %v1234_v58 = vadd.f32 %v1233_v57, %v1232_v56  ;;  %791 = vrot.lane.b32.xlu0 %v1837_v55, %s1530_s20 }
 0x1df   : > { %1483 = vmatpush3.bf16.msra.mxu0 %v1482_v47 }
 0x1e0   : > { %v1276_v59 = vpop.f32.mrb[20].mxu0  ;;  %1484 = vmatprep.subr.bf16.mxu0 %v1532_v38 }
 0x1e1   : > { %v1277_v60 = vpop.f32.mrb[21].mxu0 }
 0x1e2   : > { %v1278_v61 = vadd.f32 %v1277_v60, %v1276_v59 }
 0x1e4   : > { %v1235_v62 = vpop.f32.mrb[6].mxu1  ;;  %v1841_v0 = vadd.f32 %v1278_v61, %v1234_v58 }
 0x1e5   : > { %v1279_v63 = vpop.f32.mrb[22].mxu0  ;;  %v1236_v1 = vpop.f32.mrb[7].mxu1 }
 0x1e6   : > { %v1280_v2 = vpop.f32.mrb[23].mxu0  ;;  %v1237_v3 = vadd.f32 %v1236_v1, %v1235_v62  ;;  %793 = vrot.lane.b32.xlu1 %v1841_v0, %s1530_s20  ;;  %v891_v62 = vld [vmem:[%s2035_s5 + $0xf0] sm:$0xff] }
 0x1e7   : > { %v1281_v4 = vadd.f32 %v1280_v2, %v1279_v63  ;;  %v876_v2 = vld [vmem:[%s2035_s5 + $0x78] sm:$0xff] }
 0x1e9   : > { %v1845_v6 = vadd.f32 %v1281_v4, %v1237_v3 }
 0x1eb   : > { %795 = vrot.lane.b32.xlu1 %v1845_v6, %s1530_s20 }
 0x248   : > { %v790_v51 = vpop.permute.xlu0 %789 }
 0x249   : > { %v801_v52 = vmax.f32 %v1833_v49, %v790_v51  ;;  %v892_v49 = vld [vmem:[%s2035_s5 + $0xf8] sm:$0xff] }
 0x24a   : > { %v1468_v1 = vpack.c.bf16 %v892_v49, %v891_v62 }
 0x24b   : > { %v812_v53 = vadd.f32 %v1188_v50, %v801_v52  ;;  %v1026_v52 = vld [vmem:[%s2037_s7 + $0x50] sm:$0xff] }
 0x24c   : > { %1469 = vmatprep.subr.bf16.mxu1 %v1468_v1 }
 0x24d   : > { %v816_v54 = vmax.f32 %v812_v53, 0.0  ;;  %v1027_v53 = vld [vmem:[%s2037_s7 + $0x58] sm:$0xff] }
 0x24f   : > { %821 = vst.msk [vmem:[#allocation3] sm:$0xff] %vm820_vm1, %v816_v54  ;;  %v1488_v54 = vpack.c.bf16 %v1027_v53, %v1026_v52 }
 0x250   : > { %v792_v56 = vpop.permute.xlu0 %791 }
 0x251   : > { %v802_v57 = vmax.f32 %v1837_v55, %v792_v56  ;;  %v875_v55 = vld [vmem:[%s2035_s5 + $0x70] sm:$0xff]  ;;  %v1028_v56 = vld [vmem:[%s2037_s7 + $0x60] sm:$0xff] }
 0x253   : > { %v813_v58 = vadd.f32 %v1188_v50, %v802_v57  ;;  %v1029_v57 = vld [vmem:[%s2037_s7 + $0x68] sm:$0xff] }
 0x255   : > { %v817_v59 = vmax.f32 %v813_v58, 0.0  ;;  %v1491_v58 = vpack.c.bf16 %v1029_v57, %v1028_v56 }
 0x257   : > { %822 = vst.msk [vmem:[#allocation3 + $0x8] sm:$0xff] %vm820_vm1, %v817_v59  ;;  %v1189_v59 = vld [vmem:[%s2036_s6] ss:$0 sm:$0xff] }
 0x258   : > { %v794_v60 = vpop.permute.xlu1 %793 }
 0x259   : > { %v803_v61 = vmax.f32 %v1841_v0, %v794_v60  ;;  %v1470_v0 = vpack.c.bf16 %v876_v2, %v875_v55  ;;  %v1030_v55 = vld [vmem:[%s2037_s7 + $0x70] sm:$0xff]  ;;  %v1031_v2 = vld [vmem:[%s2037_s7 + $0x78] sm:$0xff] }
 0x25b   : > { %v814_v63 = vadd.f32 %v1188_v50, %v803_v61  ;;  %1471 = vmatpush3.bf16.msra.mxu1 %v1470_v0  ;;  %v1494_v0 = vpack.c.bf16 %v1031_v2, %v1030_v55 }
 0x25d   : > { %v796_v3 = vpop.permute.xlu1 %795  ;;  %v818_v4 = vmax.f32 %v814_v63, 0.0 }
 0x25e   : > { %v804_v7 = vmax.f32 %v1845_v6, %v796_v3  ;;  %v830_v10 = vld [vmem:[#allocation3 + $0x1] ss:$2 sm:$0xff]  ;;  %v826_v19 = vld [vmem:[#allocation3] ss:$2 sm:$0xff] }
 0x25f   : > { %823 = vst.msk [vmem:[#allocation3 + $0x10] sm:$0xff] %vm820_vm1, %v818_v4 }
 0x260   : > { %v815_v8 = vadd.f32 %v1188_v50, %v804_v7  ;;  %v1025_v50 = vld [vmem:[%s2037_s7 + $0x48] sm:$0xff] }
 0x261   : > { %v1485_v51 = vpack.c.bf16 %v1025_v50, %v1024_v48 }
 0x262   : > { %v819_v9 = vmax.f32 %v815_v8, 0.0 }
 0x263   : > { %1486 = vmatpush3.bf16.msra.mxu0 %v1485_v51 }
 0x264   : > { %825 = vst.msk [vmem:[#allocation3 + $0x18] sm:$0x3f] %vm824_vm2, %v819_v9  ;;  %1487 = vmatprep.subr.bf16.mxu0 %v1532_v38 }
 0x266   : > { %v838_v11 = vld [vmem:[#allocation3 + $0x3] ss:$2 sm:$0xff]  ;;  %v834_v18 = vld [vmem:[#allocation3 + $0x2] ss:$2 sm:$0xff] }
 0x267   : > { %v1511_v12 = vpack.i.bf16 %v830_v10, %v838_v11  ;;  %1489 = vmatpush3.bf16.msra.mxu0 %v1488_v54 }
 0x268   : > { %1490 = vmatprep.subr.bf16.mxu0 %v1532_v38 }
 0x269   : > { %1512 = vrot.lane.b32.xlu0 %v1511_v12, %s1530_s20 }
 0x26b   : > { %v832_v13 = vld [vmem:[#allocation3 + $0x11] ss:$2 sm:$0x3f]  ;;  %v836_v25 = vld [vmem:[#allocation3 + $0x12] ss:$2 sm:$0x3f]  ;;  %1492 = vmatpush3.bf16.msra.mxu0 %v1491_v58 }
 0x26c   : > { %v840_v14 = vld [vmem:[#allocation3 + $0x13] ss:$2 sm:$0x3f]  ;;  %v828_v26 = vld [vmem:[#allocation3 + $0x10] ss:$2 sm:$0x3f]  ;;  %1493 = vmatprep.subr.bf16.mxu0 %v1532_v38 }
 0x26d   : > { %v1516_v15 = vpack.i.bf16 %v832_v13, %v840_v14 }
 0x26f   : > { %1517 = vrot.lane.b32.xlu1 %v1516_v15, %s1530_s20  ;;  %1495 = vmatpush3.bf16.msra.mxu0 %v1494_v0 }
 0x2db   : > { %v1513_v16 = vpop.permute.xlu0 %1512 }
 0x2dc   : > { %v1515_v6 = vunpack.i.h.bf16 %v1513_v16  ;;  %v1514_v17 = vunpack.i.l.bf16 %v1513_v16 }
 0x2de   : > { %v859_v20 = vsel %vm820_vm1, %v834_v18, %v1514_v17  ;;  %v857_v21 = vsel %vm820_vm1, %v826_v19, %v1515_v6  ;;  %v1190_v17 = vld [vmem:[%s2038_s8] ss:$0 sm:$0xff] }
 0x2df   : > { %957 = vmatprep.mubr.f32.mxu1 %v859_v20 }
 0x2e0   : > { %958 = vmatmul.mubr.f32.vlgmr.msra.gmra.mrb[8].mxu1 %v857_v21 }
 0x2e1   : > { %v1518_v22 = vpop.permute.xlu1 %1517 }
 0x2e2   : > { %v1520_v23 = vunpack.i.h.bf16 %v1518_v22  ;;  %v1519_v24 = vunpack.i.l.bf16 %v1518_v22 }
 0x2e4   : > { %v860_v27 = vsel %vm820_vm1, %v836_v25, %v1519_v24  ;;  %v858_v28 = vsel %vm820_vm1, %v828_v26, %v1520_v23 }
 0x2e5   : > { %962 = vmatprep.mubr.f32.mxu1 %v860_v27 }
 0x2e6   : > { %963 = vmatmul.mubr.f32.gmra.mrb[10].mxu1 %v858_v28 }
 0x3b3   : > { %v1314_v29 = vpop.f32.mrb[8].mxu1 }
 0x3b4   : > { %v1315_v30 = vpop.f32.mrb[9].mxu1 }
 0x3b5   : > { %v1316_v31 = vadd.f32 %v1315_v30, %v1314_v29 }
 0x3b7   : > { %970 = vrot.lane.b32.xlu0 %v1316_v31, %s1531_s25 }
 0x3b9   : > { %v1317_v32 = vpop.f32.mrb[10].mxu1 }
 0x3ba   : > { %v1318_v33 = vpop.f32.mrb[11].mxu1 }
 0x3bb   : > { %v1319_v34 = vadd.f32 %v1318_v33, %v1317_v32 }
 0x3bd   : > { %972 = vrot.lane.b32.xlu1 %v1319_v34, %s1531_s25 }
 0x429   : > { %v971_v60 = vpop.permute.xlu0 %970 }
 0x42a   : > { %v976_v61 = vmax.f32 %v1316_v31, %v971_v60 }
 0x42c   : > { %v985_v62 = vadd.f32 %v1189_v59, %v976_v61 }
 0x42e   : > { %v987_v63 = vmax.f32 %v985_v62, 0.0 }
 0x42f   : > { %v973_v49 = vpop.permute.xlu1 %972 }
 0x430   : > { %v977_v1 = vmax.f32 %v1319_v34, %v973_v49  ;;  %990 = vst.msk [vmem:[#allocation4] sm:$0xff] %vm989_vm3, %v987_v63 }
 0x432   : > { %v986_v3 = vadd.f32 %v1189_v59, %v977_v1 }
 0x434   : > { %v988_v4 = vmax.f32 %v986_v3, 0.0 }
 0x436   : > { %992 = vst.msk [vmem:[#allocation4 + $0x8] sm:$0x3f] %vm991_vm4, %v988_v4 }
 0x43d   : > { %v997_v7 = vld [vmem:[#allocation4 + $0x2] ss:$2 sm:$0x3f]  ;;  %v995_v8 = vld [vmem:[#allocation4 + $0x1] ss:$2 sm:$0x3f] }
 0x43e   : > { %1005 = vrot.lane.b32.xlu1 %v997_v7, %s1530_s20  ;;  %1001 = vrot.lane.b32.xlu0 %v995_v8, %s1534_s15  ;;  %v999_v9 = vld [vmem:[#allocation4 + $0x3] ss:$2 sm:$0x3f]  ;;  %v993_v11 = vld [vmem:[#allocation4] ss:$2 sm:$0x3f] }
 0x442   : > { %1009 = vrot.lane.b32.xlu0 %v999_v9, %s1531_s25  ;;  %s1178_s25 = sshll.u32 %s2041_s10, 3 }
 0x443   : > { %s330_s21 = scalar_lea.vmem %s2039_s9, %s1178_s25 }
 0x4b0   : > { %v1002_v10 = vpop.permute.xlu0 %1001  ;;  %v1006_v12 = vpop.permute.xlu1 %1005 }
 0x4b1   : > { %v1012_v13 = vsel %vm989_vm3, %v993_v11, %v1002_v10 }
 0x4b2   : > { %v1013_v15 = vsel %vm820_vm1, %v1012_v13, %v1006_v12 }
 0x4b4   : > { %v1010_v14 = vpop.permute.xlu0 %1009 }
 0x4b5   : > { %v1015_v5 = vsel %vm1014_vm6, %v1013_v15, %v1010_v14 }
 0x4b6   : > { %1370 = vmatmul.mubr.f32.vlgmr.msra.gmra.mrb[24].mxu0 %v1015_v5 }
 0x589   : > { %v1098_v16 = vpop.f32.mrb[24].mxu0 }
 0x58a   : > { %1103 = vrot.lane.b32.xlu1 %v1098_v16, %s1535_s16  ;;  %v1371_v6 = vpop.f32.mrb[25].mxu0 }
 0x5fc   : > { %v1104_v18 = vpop.permute.xlu1 %1103 }
 0x5fd   : > { %v1106_v19 = vmax.f32 %v1098_v16, %v1104_v18 }
 0x5ff   : > { %v1114_v20 = vadd.f32 %v1190_v17, %v1106_v19 }
 0x601   : > { %v1115_v21 = vmax.f32 %v1114_v20, 0.0 }
 0x603   : > { %1117 = vst.msk [vmem:[%s330_s21] sm:$0x3f] %vm1116_vm7, %v1115_v21 }
 0x604 PF: > { %s19_s30 = sadd.s32 1, %s1527_s30  }
 0x605   : > { %p16_p4 = scmp.ge.s32.totalorder %s19_s30, 4  }
 0x607   :  { %18 = sbr.rel (!%p16_p4) target bundleno = 1 (0x1), region = 111 }

</bundles_post_ra>
